<compile_context>
chip_gen: v7x
topology: tpu7x:2x2x1
jax: 0.10.0
libtpu: 0.0.40
codegen_flags: <defaults>
</compile_context>

<pallas_src>
import functools

import jax
import jax.numpy as jnp
from jax.experimental import pallas as pl
from jax.experimental.pallas import tpu as pltpu


def mlp_kernel(x_ref, w1_ref, b1_ref, w2_ref, b2_ref, o_ref, *,
               negative_slope=0.01):
    # Hot path: both matmuls + bias + LeakyReLU, fully in VMEM.
    # x_ref: (TB, 784) in the input dtype; w1_ref: (784, 32); w2_ref: (32, 10).
    x = x_ref[...]
    w1 = w1_ref[...]
    # Cast x to the matmul compute dtype (w1's dtype) inside the kernel —
    # VMEM-local, no extra HBM traffic.  f32 accumulation on the MXU.
    h = jnp.dot(x.astype(w1.dtype), w1,
                preferred_element_type=jnp.float32)          # (TB, 32) f32 acc
    h = h + b1_ref[...].astype(jnp.float32)                  # broadcast (1, 32)
    # LeakyReLU, PyTorch default negative_slope = 0.01 (elementwise, f32).
    h = jnp.where(h > 0, h, negative_slope * h)
    # Second matmul kept in f32: (TB,32)@(32,10) is negligible MXU work and
    # preserves precision regardless of the first-matmul compute dtype.
    y = jnp.dot(h, w2_ref[...].astype(jnp.float32),
                preferred_element_type=jnp.float32)          # (TB, 10) f32 acc
    y = y + b2_ref[...].astype(jnp.float32)                  # broadcast (1, 10)
    o_ref[...] = y.astype(o_ref.dtype)


def mlp_forward(x_nchw, w1, b1, w2, b2, *, tile_b=4096,
                compute_dtype=jnp.float32, out_dtype=None):
    """x_nchw: (B, C, H, W) with C*H*W == in_features. Returns (B, out_features)."""
    B = x_nchw.shape[0]
    input_dim = w1.shape[0]
    output_dim = w2.shape[1]
    if out_dtype is None:
        out_dtype = x_nchw.dtype

    # nn.Flatten (row-major on NCHW) — a free reshape, no data movement.
    # x is NOT cast or padded here: the kernel reads it in its native dtype
    # (one HBM pass), and partial last blocks are handled by the grid.
    x = x_nchw.reshape(B, input_dim)

    # Weights/biases are tiny and VMEM-resident; casting them in the wrapper
    # is negligible.  The first matmul runs in `compute_dtype` (w1's dtype).
    w1c = w1.astype(compute_dtype)
    w2c = w2.astype(compute_dtype)
    b1f = b1.astype(jnp.float32)
    b2f = b2.astype(jnp.float32)

    # Batch tile: full batch if small (full-extent block is exempt from the
    # (8,128) rule), otherwise TB rows (TB multiple of 8).  Ragged last block
    # is fine: Pallas masks its DMAs and rows are independent.
    TB = B if B <= tile_b else tile_b
    n_blocks = pl.cdiv(B, TB)

    # Scoped-VMEM budget: double-buffered x and out tiles + resident params,
    # plus a small margin.  Raised explicitly so big tiles also fit v5e's
    # 16 MiB scoped default; stays far below every generation's physical VMEM.
    x_tile_bytes = TB * input_dim * x.dtype.itemsize
    o_tile_bytes = TB * output_dim * jnp.dtype(out_dtype).itemsize
    param_bytes = (w1c.size * w1c.dtype.itemsize + w2c.size * w2c.dtype.itemsize
                   + b1f.size * 4 + b2f.size * 4)
    vmem_limit = int(2 * (x_tile_bytes + o_tile_bytes) + 2 * param_bytes
                     + (4 << 20))
    vmem_limit = max(vmem_limit, 32 << 20)

    kernel = functools.partial(mlp_kernel, negative_slope=0.01)

    out = pl.pallas_call(
        kernel,
        out_shape=jax.ShapeDtypeStruct((B, output_dim), out_dtype),
        grid=(n_blocks,),
        in_specs=[
            pl.BlockSpec((TB, input_dim), lambda i: (i, 0)),   # streamed x
            pl.BlockSpec(w1c.shape, lambda i: (0, 0)),         # VMEM-resident
            pl.BlockSpec(b1f.shape, lambda i: (0, 0)),
            pl.BlockSpec(w2c.shape, lambda i: (0, 0)),
            pl.BlockSpec(b2f.shape, lambda i: (0, 0)),
        ],
        out_specs=pl.BlockSpec((TB, output_dim), lambda i: (i, 0)),
        compiler_params=pltpu.CompilerParams(
            dimension_semantics=("parallel",),                 # megacore
            vmem_limit_bytes=vmem_limit),
    )(x, w1c, b1f, w2c, b2f)

    return out


def init_params(key, input_dim=784, output_dim=10, nhid=32, dtype=jnp.float32):
    """Deterministic init mirroring nn.Linear's U(-1/sqrt(fan_in), +1/sqrt(fan_in))."""
    k1, k2, k3, k4 = jax.random.split(key, 4)
    bound1 = 1.0 / jnp.sqrt(input_dim)
    bound2 = 1.0 / jnp.sqrt(nhid)
    w1 = jax.random.uniform(k1, (input_dim, nhid), dtype, -bound1, bound1)
    b1 = jax.random.uniform(k2, (1, nhid), dtype, -bound1, bound1)
    w2 = jax.random.uniform(k3, (nhid, output_dim), dtype, -bound2, bound2)
    b2 = jax.random.uniform(k4, (1, output_dim), dtype, -bound2, bound2)
    return w1, b1, w2, b2


def _ref_forward(x_nchw, w1, b1, w2, b2, compute_dtype):
    """Plain-JAX reference with the same dtype strategy as the kernel."""
    B = x_nchw.shape[0]
    xf = x_nchw.reshape(B, -1)
    h = jnp.dot(xf.astype(compute_dtype), w1.astype(compute_dtype),
                preferred_element_type=jnp.float32) + b1.astype(jnp.float32)
    h = jnp.where(h > 0, h, 0.01 * h)
    y = jnp.dot(h, w2.astype(jnp.float32),
                preferred_element_type=jnp.float32) + b2.astype(jnp.float32)
    return y


if __name__ == "__main__":
    key = jax.random.PRNGKey(0)
    k_x, k_x2, k_x3, k_p = jax.random.split(key, 4)

    B, C, H, W = 2, 1, 28, 28          # 1*28*28 = 784 = input_dim
    x = jax.random.normal(k_x, (B, C, H, W), jnp.float32)
    w1, b1, w2, b2 = init_params(k_p)

    # --- Case 1: tiny batch, single full-extent block, exact f32 path -------
    out = mlp_forward(x, w1, b1, w2, b2, out_dtype=jnp.float32)
    out = jax.block_until_ready(out)
    ref = _ref_forward(x, w1, b1, w2, b2, jnp.float32)
    assert out.shape == (B, 10)
    assert jnp.allclose(out, ref, atol=1e-5, rtol=1e-5)

    # --- Case 2: batch not divisible by the tile -> ragged last block -------
    B2 = 12
    x2 = jax.random.normal(k_x2, (B2, C, H, W), jnp.float32)
    out2 = mlp_forward(x2, w1, b1, w2, b2, tile_b=8, out_dtype=jnp.float32)
    out2 = jax.block_until_ready(out2)
    ref2 = _ref_forward(x2, w1, b1, w2, b2, jnp.float32)
    assert out2.shape == (B2, 10)
    assert jnp.allclose(out2, ref2, atol=1e-5, rtol=1e-5)

    # --- Case 3: multi-step pipeline + ragged tail at a bigger tile ---------
    B3 = 300
    x3 = jax.random.normal(k_x3, (B3, C, H, W), jnp.float32)
    out3 = mlp_forward(x3, w1, b1, w2, b2, tile_b=128, out_dtype=jnp.float32)
    out3 = jax.block_until_ready(out3)
    ref3 = _ref_forward(x3, w1, b1, w2, b2, jnp.float32)
    assert out3.shape == (B3, 10)
    assert jnp.allclose(out3, ref3, atol=1e-5, rtol=1e-5)

    # --- Case 4: bf16 first-matmul path (in-kernel cast), loose tolerance ---
    out4 = mlp_forward(x2, w1, b1, w2, b2, tile_b=8,
                       compute_dtype=jnp.bfloat16, out_dtype=jnp.float32)
    out4 = jax.block_until_ready(out4)
    ref4 = _ref_forward(x2, w1, b1, w2, b2, jnp.bfloat16)
    assert jnp.allclose(out4, ref4, atol=1e-2, rtol=1e-2)

    print("KERNEL_OK")
</pallas_src>

<mosaic_0001>
module attributes {stable_mosaic.version = 11 : i64} {
  func.func @mlp_kernel(%arg0: i32, %arg1: memref<2x784xf32, #tpu.memory_space<vmem>>, %arg2: memref<784x32xf32, #tpu.memory_space<vmem>>, %arg3: memref<1x32xf32, #tpu.memory_space<vmem>>, %arg4: memref<32x10xf32, #tpu.memory_space<vmem>>, %arg5: memref<1x10xf32, #tpu.memory_space<vmem>>, %arg6: memref<2x10xf32, #tpu.memory_space<vmem>>) attributes {dimension_semantics = [#tpu.dimension_semantics<parallel>], iteration_bounds = array<i64: 1>, scalar_prefetch = 0 : i64, scratch_operands = 0 : i64, tpu.core_type = #tpu.core_type<tc>, window_params = [{transform_indices = @transform_0, window_bounds = array<i64: 2, 784>}, {pipeline_mode = #tpu.pipeline_mode<synchronous>, transform_indices = @transform_1, window_bounds = array<i64: 784, 32>}, {pipeline_mode = #tpu.pipeline_mode<synchronous>, transform_indices = @transform_2, window_bounds = array<i64: 1, 32>}, {pipeline_mode = #tpu.pipeline_mode<synchronous>, transform_indices = @transform_3, window_bounds = array<i64: 32, 10>}, {pipeline_mode = #tpu.pipeline_mode<synchronous>, transform_indices = @transform_4, window_bounds = array<i64: 1, 10>}, {transform_indices = @transform_5, window_bounds = array<i64: 2, 10>}]} {
    %c0 = arith.constant 0 : index
    %c0_0 = arith.constant 0 : index
    %0 = vector.load %arg1[%c0, %c0_0] : memref<2x784xf32, #tpu.memory_space<vmem>>, vector<2x784xf32>
    %c0_1 = arith.constant 0 : index
    %c0_2 = arith.constant 0 : index
    %1 = vector.load %arg2[%c0_1, %c0_2] : memref<784x32xf32, #tpu.memory_space<vmem>>, vector<784x32xf32>
    %cst = arith.constant dense<0.000000e+00> : vector<2x32xf32>
    %2 = tpu.matmul %0, %1, %cst {dimension_numbers = #tpu.dot_dimension_numbers<[1], [0], [0], [1], [0, 0, 1, 1], [], []>} : vector<2x784xf32>, vector<784x32xf32>, vector<2x32xf32> -> vector<2x32xf32>
    %c0_3 = arith.constant 0 : index
    %c0_4 = arith.constant 0 : index
    %3 = vector.load %arg3[%c0_3, %c0_4] : memref<1x32xf32, #tpu.memory_space<vmem>>, vector<1x32xf32>
    %4 = vector.broadcast %3 : vector<1x32xf32> to vector<2x32xf32>
    %5 = arith.addf %2, %4 : vector<2x32xf32>
    %cst_5 = arith.constant 0.000000e+00 : f32
    %6 = vector.broadcast %cst_5 : f32 to vector<2x32xf32>
    %7 = arith.cmpf ogt, %5, %6 : vector<2x32xf32>
    %cst_6 = arith.constant 0.00999999977 : f32
    %8 = vector.broadcast %cst_6 : f32 to vector<2x32xf32>
    %9 = arith.mulf %8, %5 : vector<2x32xf32>
    %10 = arith.select %7, %5, %9 : vector<2x32xi1>, vector<2x32xf32>
    %c0_7 = arith.constant 0 : index
    %c0_8 = arith.constant 0 : index
    %11 = vector.load %arg4[%c0_7, %c0_8] : memref<32x10xf32, #tpu.memory_space<vmem>>, vector<32x10xf32>
    %cst_9 = arith.constant dense<0.000000e+00> : vector<2x10xf32>
    %12 = tpu.matmul %10, %11, %cst_9 {dimension_numbers = #tpu.dot_dimension_numbers<[1], [0], [0], [1], [0, 0, 1, 1], [], []>} : vector<2x32xf32>, vector<32x10xf32>, vector<2x10xf32> -> vector<2x10xf32>
    %c0_10 = arith.constant 0 : index
    %c0_11 = arith.constant 0 : index
    %13 = vector.load %arg5[%c0_10, %c0_11] : memref<1x10xf32, #tpu.memory_space<vmem>>, vector<1x10xf32>
    %14 = vector.broadcast %13 : vector<1x10xf32> to vector<2x10xf32>
    %15 = arith.addf %12, %14 : vector<2x10xf32>
    %c0_12 = arith.constant 0 : index
    %c0_13 = arith.constant 0 : index
    %16 = vector.load %arg6[%c0_12, %c0_13] : memref<2x10xf32, #tpu.memory_space<vmem>>, vector<2x10xf32>
    tpu.vector_store %arg6[%c0_12, %c0_13], %15 {strides = array<i32>} : memref<2x10xf32, #tpu.memory_space<vmem>>, vector<2x10xf32>,
    return
  }
  func.func @transform_0(%arg0: i32) -> (i32, i32) {
    %c0_i32 = arith.constant 0 : i32
    %c0_i32_0 = arith.constant 0 : i32
    return %arg0, %c0_i32 : i32, i32
  }
  func.func @transform_1(%arg0: i32) -> (i32, i32) {
    %c0_i32 = arith.constant 0 : i32
    %c0_i32_0 = arith.constant 0 : i32
    %c0_i32_1 = arith.constant 0 : i32
    return %c0_i32, %c0_i32_0 : i32, i32
  }
  func.func @transform_2(%arg0: i32) -> (i32, i32) {
    %c0_i32 = arith.constant 0 : i32
    %c0_i32_0 = arith.constant 0 : i32
    %c0_i32_1 = arith.constant 0 : i32
    return %c0_i32, %c0_i32_0 : i32, i32
  }
  func.func @transform_3(%arg0: i32) -> (i32, i32) {
    %c0_i32 = arith.constant 0 : i32
    %c0_i32_0 = arith.constant 0 : i32
    %c0_i32_1 = arith.constant 0 : i32
    return %c0_i32, %c0_i32_0 : i32, i32
  }
  func.func @transform_4(%arg0: i32) -> (i32, i32) {
    %c0_i32 = arith.constant 0 : i32
    %c0_i32_0 = arith.constant 0 : i32
    %c0_i32_1 = arith.constant 0 : i32
    return %c0_i32, %c0_i32_0 : i32, i32
  }
  func.func @transform_5(%arg0: i32) -> (i32, i32) {
    %c0_i32 = arith.constant 0 : i32
    %c0_i32_0 = arith.constant 0 : i32
    return %arg0, %c0_i32 : i32, i32
  }
}

</mosaic_0001>

<bundles_post_ra>
// kernel: tpu_custom_call.1
= control target key start
LH: loop header
LB: loop body
LE: loop exit
PB: predicated region body
PF: predicated region fallthrough
CT: control target
= control target key end

     0   :  { %v827_v43 = vmov 1983009808   ;;  %v134_v45 = vlaneseq  ;;  %s1206_s0 = inlined_call_operand.vmem [shape: f32[2,784], index: 0, kind: input, shape index: {}]   ;;  %s1207_s1 = inlined_call_operand.vmem [shape: f32[784,32], index: 1, kind: input, shape index: {}]   ;;  %s1208_s2 = inlined_call_operand.vmem [shape: f32[1,32], index: 2, kind: input, shape index: {}]   ;;  %s1209_s3 = inlined_call_operand.vmem [shape: f32[32,10], index: 3, kind: input, shape index: {}]   ;;  %s1210_s4 = inlined_call_operand.vmem [shape: f32[1,10], index: 4, kind: input, shape index: {}]   ;;  %s1211_s5 = inlined_call_operand.hbm [shape: f32[2,10], index: 5, kind: output, shape index: {}]  }
   0x1   :  { %v39_v0 = vld [vmem:[%s1207_s1 + $0x80] sm:$0xff]  ;;  %v40_v1 = vld [vmem:[%s1207_s1 + $0x88] sm:$0xff]  ;;  %v41_v11 = vld [vmem:[%s1207_s1 + $0x90] sm:$0xff]  ;;  %v132_v44 = vunpack.c.l.s4 %v827_v43 }
   0x2   :  { %v23_v2 = vld [vmem:[%s1207_s1] sm:$0xff]  ;;  %v691_v3 = vpack.c.bf16 %v40_v1, %v39_v0  ;;  %v24_v4 = vld [vmem:[%s1207_s1 + $0x8] sm:$0xff]  ;;  %v42_v13 = vld [vmem:[%s1207_s1 + $0x98] sm:$0xff]  ;;  %v135_v60 = vshrl.u32 %v134_v45, 7 }
   0x3   :  { %v71_v5 = vld [vmem:[%s1207_s1 + $0x180] sm:$0xff]  ;;  %v72_v6 = vld [vmem:[%s1207_s1 + $0x188] sm:$0xff]  ;;  %v693_v7 = vpack.c.bf16 %v24_v4, %v23_v2  ;;  %v25_v14 = vld [vmem:[%s1207_s1 + $0x10] sm:$0xff]  ;;  %v695_v16 = vpack.c.bf16 %v42_v13, %v41_v11  ;;  %v133_v59 = vunpack.c.0.s8 %v132_v44 }
   0x4   :  { %v723_v8 = vpack.c.bf16 %v72_v6, %v71_v5  ;;  %v55_v9 = vld [vmem:[%s1207_s1 + $0x100] sm:$0xff]  ;;  %v56_v10 = vld [vmem:[%s1207_s1 + $0x108] sm:$0xff]  ;;  %692 = vmatprep.subr.bf16.mxu0 %v691_v3  ;;  %v26_v15 = vld [vmem:[%s1207_s1 + $0x18] sm:$0xff] }
   0x5   :  { %v725_v12 = vpack.c.bf16 %v56_v10, %v55_v9  ;;  %694 = vmatpush3.bf16.msra.mxu0 %v693_v7  ;;  %v697_v17 = vpack.c.bf16 %v26_v15, %v25_v14  ;;  %v73_v18 = vld [vmem:[%s1207_s1 + $0x190] sm:$0xff]  ;;  %v74_v19 = vld [vmem:[%s1207_s1 + $0x198] sm:$0xff]  ;;  %v43_v23 = vld [vmem:[%s1207_s1 + $0xa0] sm:$0xff]  ;;  %v1006_v10 = vsub.s32 %v133_v59, %v135_v60 }
   0x6   :  { %724 = vmatprep.subr.bf16.mxu1 %v723_v8  ;;  %v57_v20 = vld [vmem:[%s1207_s1 + $0x110] sm:$0xff]  ;;  %v727_v21 = vpack.c.bf16 %v74_v19, %v73_v18  ;;  %v58_v22 = vld [vmem:[%s1207_s1 + $0x118] sm:$0xff]  ;;  %v44_v24 = vld [vmem:[%s1207_s1 + $0xa8] sm:$0xff]  ;;  %696 = vmatprep.subr.bf16.mxu0 %v695_v16 }
   0x7   :  { %726 = vmatpush3.bf16.msra.mxu1 %v725_v12  ;;  %v729_v25 = vpack.c.bf16 %v58_v22, %v57_v20  ;;  %v699_v26 = vpack.c.bf16 %v44_v24, %v43_v23  ;;  %v27_v27 = vld [vmem:[%s1207_s1 + $0x20] sm:$0xff]  ;;  %v28_v28 = vld [vmem:[%s1207_s1 + $0x28] sm:$0xff]  ;;  %v45_v35 = vld [vmem:[%s1207_s1 + $0xb0] sm:$0xff] }
   0x8   :  { %v75_v29 = vld [vmem:[%s1207_s1 + $0x1a0] sm:$0xff]  ;;  %728 = vmatprep.subr.bf16.mxu1 %v727_v21  ;;  %v76_v30 = vld [vmem:[%s1207_s1 + $0x1a8] sm:$0xff]  ;;  %v701_v33 = vpack.c.bf16 %v28_v28, %v27_v27  ;;  %v46_v36 = vld [vmem:[%s1207_s1 + $0xb8] sm:$0xff] }
   0x9   :  { %v59_v31 = vld [vmem:[%s1207_s1 + $0x120] sm:$0xff]  ;;  %v60_v32 = vld [vmem:[%s1207_s1 + $0x128] sm:$0xff]  ;;  %698 = vmatpush3.bf16.msra.mxu0 %v697_v17  ;;  %v731_v34 = vpack.c.bf16 %v76_v30, %v75_v29  ;;  %v29_v37 = vld [vmem:[%s1207_s1 + $0x30] sm:$0xff]  ;;  %v703_v39 = vpack.c.bf16 %v46_v36, %v45_v35 }
   0xa   :  { %700 = vmatprep.subr.bf16.mxu0 %v699_v26  ;;  %v733_v38 = vpack.c.bf16 %v60_v32, %v59_v31  ;;  %v30_v40 = vld [vmem:[%s1207_s1 + $0x38] sm:$0xff]  ;;  %v77_v41 = vld [vmem:[%s1207_s1 + $0x1b0] sm:$0xff]  ;;  %v47_v49 = vld [vmem:[%s1207_s1 + $0xc0] sm:$0xff] }
   0xb   :  { %730 = vmatpush3.bf16.msra.mxu1 %v729_v25  ;;  %v78_v42 = vld [vmem:[%s1207_s1 + $0x1b8] sm:$0xff]  ;;  %v61_v47 = vld [vmem:[%s1207_s1 + $0x130] sm:$0xff]  ;;  %v48_v50 = vld [vmem:[%s1207_s1 + $0xc8] sm:$0xff]  ;;  %v705_v51 = vpack.c.bf16 %v30_v40, %v29_v37 }
   0xc   :  { %732 = vmatprep.subr.bf16.mxu1 %v731_v34  ;;  %v735_v46 = vpack.c.bf16 %v78_v42, %v77_v41  ;;  %v62_v48 = vld [vmem:[%s1207_s1 + $0x138] sm:$0xff]  ;;  %v79_v52 = vld [vmem:[%s1207_s1 + $0x1c0] sm:$0xff]  ;;  %v80_v53 = vld [vmem:[%s1207_s1 + $0x1c8] sm:$0xff]  ;;  %v707_v55 = vpack.c.bf16 %v48_v50, %v47_v49 }
   0xd   :  { %702 = vmatpush3.bf16.msra.mxu0 %v701_v33  ;;  %v737_v54 = vpack.c.bf16 %v62_v48, %v61_v47  ;;  %v31_v56 = vld [vmem:[%s1207_s1 + $0x40] sm:$0xff]  ;;  %v32_v57 = vld [vmem:[%s1207_s1 + $0x48] sm:$0xff]  ;;  %v739_v61 = vpack.c.bf16 %v80_v53, %v79_v52  ;;  %v49_v63 = vld [vmem:[%s1207_s1 + $0xd0] sm:$0xff] }
   0xe   :  { %704 = vmatprep.subr.bf16.mxu0 %v703_v39  ;;  %v63_v58 = vld [vmem:[%s1207_s1 + $0x140] sm:$0xff]  ;;  %v64_v62 = vld [vmem:[%s1207_s1 + $0x148] sm:$0xff]  ;;  %v50_v0 = vld [vmem:[%s1207_s1 + $0xd8] sm:$0xff]  ;;  %v709_v3 = vpack.c.bf16 %v32_v57, %v31_v56 }
   0xf   :  { %734 = vmatpush3.bf16.msra.mxu1 %v733_v38  ;;  %v81_v1 = vld [vmem:[%s1207_s1 + $0x1d0] sm:$0xff]  ;;  %v82_v2 = vld [vmem:[%s1207_s1 + $0x1d8] sm:$0xff]  ;;  %v741_v5 = vpack.c.bf16 %v64_v62, %v63_v58  ;;  %v711_v6 = vpack.c.bf16 %v50_v0, %v49_v63  ;;  %v51_v12 = vld [vmem:[%s1207_s1 + $0xe0] sm:$0xff] }
  0x10   :  { %736 = vmatprep.subr.bf16.mxu1 %v735_v46  ;;  %v33_v4 = vld [vmem:[%s1207_s1 + $0x50] sm:$0xff]  ;;  %v34_v7 = vld [vmem:[%s1207_s1 + $0x58] sm:$0xff]  ;;  %v743_v11 = vpack.c.bf16 %v82_v2, %v81_v1  ;;  %v52_v13 = vld [vmem:[%s1207_s1 + $0xe8] sm:$0xff] }
  0x11   :  { %706 = vmatpush3.bf16.msra.mxu0 %v705_v51  ;;  %v65_v8 = vld [vmem:[%s1207_s1 + $0x150] sm:$0xff]  ;;  %v66_v9 = vld [vmem:[%s1207_s1 + $0x158] sm:$0xff]  ;;  %v83_v14 = vld [vmem:[%s1207_s1 + $0x1e0] sm:$0xff]  ;;  %v713_v16 = vpack.c.bf16 %v34_v7, %v33_v4  ;;  %v715_v19 = vpack.c.bf16 %v52_v13, %v51_v12 }
  0x12   :  { %708 = vmatprep.subr.bf16.mxu0 %v707_v55  ;;  %v84_v15 = vld [vmem:[%s1207_s1 + $0x1e8] sm:$0xff]  ;;  %v745_v17 = vpack.c.bf16 %v66_v9, %v65_v8  ;;  %v21_v18 = vld [vmem:[%s1206_s0] sm:$0xff]  ;;  %v53_v27 = vld [vmem:[%s1207_s1 + $0xf0] sm:$0xff] }
  0x13   :  { %738 = vmatpush3.bf16.msra.mxu1 %v737_v54  ;;  %v35_v20 = vld [vmem:[%s1207_s1 + $0x60] sm:$0xff]  ;;  %v36_v21 = vld [vmem:[%s1207_s1 + $0x68] sm:$0xff]  ;;  %v137_v23 = vrot.slane %v21_v18, %v1006_v10  ;;  %v130_v24 = vcombine.high %v21_v18, %v21_v18  ;;  %v747_v25 = vpack.c.bf16 %v84_v15, %v83_v14  ;;  %v54_v28 = vld [vmem:[%s1207_s1 + $0xf8] sm:$0xff] }
  0x14   :  { %740 = vmatprep.subr.bf16.mxu1 %v739_v61  ;;  %v67_v22 = vld [vmem:[%s1207_s1 + $0x160] sm:$0xff]  ;;  %v68_v26 = vld [vmem:[%s1207_s1 + $0x168] sm:$0xff]  ;;  %v85_v29 = vld [vmem:[%s1207_s1 + $0x1f0] sm:$0xff]  ;;  %v717_v33 = vpack.c.bf16 %v36_v21, %v35_v20  ;;  %v719_v35 = vpack.c.bf16 %v54_v28, %v53_v27 }
  0x15   :  { %710 = vmatpush3.bf16.msra.mxu0 %v709_v3  ;;  %v86_v30 = vld [vmem:[%s1207_s1 + $0x1f8] sm:$0xff]  ;;  %v145_v31 = vcombine.high %v137_v23, %v137_v23  ;;  %v144_v32 = vrot.slane %v130_v24, %v1006_v10  ;;  %v749_v34 = vpack.c.bf16 %v68_v26, %v67_v22  ;;  %v37_v36 = vld [vmem:[%s1207_s1 + $0x70] sm:$0xff]  ;;  %v103_v42 = vld [vmem:[%s1207_s1 + $0x280] sm:$0xff] }
  0x16   :  { %712 = vmatprep.subr.bf16.mxu0 %v711_v6  ;;  %v38_v37 = vld [vmem:[%s1207_s1 + $0x78] sm:$0xff]  ;;  %v69_v38 = vld [vmem:[%s1207_s1 + $0x170] sm:$0xff]  ;;  %v751_v40 = vpack.c.bf16 %v86_v30, %v85_v29  ;;  %v104_v43 = vld [vmem:[%s1207_s1 + $0x288] sm:$0xff] }
  0x17   :  { %742 = vmatpush3.bf16.msra.mxu1 %v741_v5  ;;  %v146_v39 = vcombine.high %v144_v32, %v144_v32  ;;  %236 = vmatprep.mubr.f32.mxu0 %v145_v31  ;;  %v70_v41 = vld [vmem:[%s1207_s1 + $0x178] sm:$0xff]  ;;  %v721_v44 = vpack.c.bf16 %v38_v37, %v37_v36  ;;  %v755_v46 = vpack.c.bf16 %v104_v43, %v103_v42  ;;  %v87_v47 = vld [vmem:[%s1207_s1 + $0x200] sm:$0xff]  ;;  %v88_v48 = vld [vmem:[%s1207_s1 + $0x208] sm:$0xff] }
  0x18   :  { %744 = vmatprep.subr.bf16.mxu1 %v743_v11  ;;  %v753_v45 = vpack.c.bf16 %v70_v41, %v69_v38  ;;  %v105_v49 = vld [vmem:[%s1207_s1 + $0x290] sm:$0xff]  ;;  %v106_v50 = vld [vmem:[%s1207_s1 + $0x298] sm:$0xff]  ;;  %v757_v51 = vpack.c.bf16 %v88_v48, %v87_v47  ;;  %v22_v53 = vld [vmem:[%s1206_s0 + $0x8] sm:$0x3f] }
  0x19   :  { %714 = vmatpush3.bf16.msra.mxu0 %v713_v16  ;;  %306 = vmatprep.mubr.f32.mxu1 %v146_v39  ;;  %v89_v52 = vld [vmem:[%s1207_s1 + $0x210] sm:$0xff]  ;;  %v119_v54 = vld [vmem:[%s1207_s1 + $0x300] sm:$0xff]  ;;  %v759_v55 = vpack.c.bf16 %v106_v50, %v105_v49  ;;  %v90_v56 = vld [vmem:[%s1207_s1 + $0x218] sm:$0xff]  ;;  %v147_v57 = vcombine.high %v22_v53, %v22_v53  ;;  %v1092_v58 = vrot.slane %v22_v53, %v1006_v10 }
  0x1a   :  { %716 = vmatprep.subr.bf16.mxu0 %v715_v19  ;;  %v120_v59 = vld [vmem:[%s1207_s1 + $0x308] sm:$0xff] }
  0x1b   :  { %746 = vmatpush3.bf16.msra.mxu1 %v745_v17 }
  0x1c   :  { %748 = vmatprep.subr.bf16.mxu1 %v747_v25 }
  0x1d   :  { %718 = vmatpush3.bf16.msra.mxu0 %v717_v33 }
  0x1e   :  { %720 = vmatprep.subr.bf16.mxu0 %v719_v35 }
  0x1f   :  { %750 = vmatpush3.bf16.msra.mxu1 %v749_v34 }
  0x20   :  { %752 = vmatprep.subr.bf16.mxu1 %v751_v40 }
  0x21   :  { %722 = vmatpush3.bf16.msra.mxu0 %v721_v44 }
  0x22   :  { %756 = vmatprep.subr.bf16.mxu0 %v755_v46 }
  0x23   :  { %754 = vmatpush3.bf16.msra.mxu1 %v753_v45 }
  0x24   :  { %10 = vsyncpa [#allocation3], 0  ;;  %v107_v60 = vld [vmem:[%s1207_s1 + $0x2a0] sm:$0xff]  ;;  %v108_v61 = vld [vmem:[%s1207_s1 + $0x2a8] sm:$0xff]  ;;  %v828_v62 = vmov 0.0|0.0   ;;  %v788_v63 = vpack.c.bf16 %v120_v59, %v119_v54  ;;  %237 = vmatmul.mubr.f32.vlgmr.msra.gmra.mrb[0].mxu0 %v137_v23  ;;  %v162_v0 = vcombine.high %v1092_v58, %v1092_v58  ;;  %v761_v1 = vpack.c.bf16 %v90_v56, %v89_v52  ;;  %s831_s24 = smov [#allocation2]  }
  0x25   :  { %787 = vmatprep.subr.bf16.mxu1 %v828_v62  ;;  %758 = vmatpush3.bf16.msra.mxu0 %v757_v51  ;;  %v763_v2 = vpack.c.bf16 %v108_v61, %v107_v60  ;;  %v91_v3 = vld [vmem:[%s1207_s1 + $0x220] sm:$0xff]  ;;  %v92_v4 = vld [vmem:[%s1207_s1 + $0x228] sm:$0xff]  ;;  %v161_v5 = vrot.slane %v147_v57, %v1006_v10  ;;  %v109_v6 = vld [vmem:[%s1207_s1 + $0x2b0] sm:$0xff]  ;;  %vm829_vm0 = vmmov 0   ;;  %v830_v8 = vmov 0.0   ;;  %s548_s25 = sshll.u32 %s831_s24, 4  ;;  %s549_s25 = int_to_ptr.vmem [resolvable:$true] %s548_s25 }
  0x26   :  { %307 = vmatmul.mubr.f32.vlgmr.msra.gmra.mrb[0].mxu1 %v144_v32  ;;  %760 = vmatprep.subr.bf16.mxu0 %v759_v55  ;;  %v110_v7 = vld [vmem:[%s1207_s1 + $0x2b8] sm:$0xff]  ;;  %vm169_vm1 = vcmask 130048   ;;  %v765_v9 = vpack.c.bf16 %v92_v4, %v91_v3  ;;  %v93_v11 = vld [vmem:[%s1207_s1 + $0x230] sm:$0xff]  ;;  %v111_v13 = vld [vmem:[%s1207_s1 + $0x2c0] sm:$0xff]  ;;  %vm466_vm3 = vcmask 261120   ;;  %vm540_vm4 = vcmask 74752   ;;  %p808_p1 = scmp.lt.s32.totalorder %s549_s25, %s549_s25 }
  0x27   :  { %376 = vmatprep.mubr.f32.mxu0 %v162_v0  ;;  %789 = vmatpush3.bf16.msra.mxu1 %v788_v63  ;;  %v767_v10 = vpack.c.bf16 %v110_v7, %v109_v6  ;;  %v94_v12 = vld [vmem:[%s1207_s1 + $0x238] sm:$0xff]  ;;  %v112_v14 = vld [vmem:[%s1207_s1 + $0x2c8] sm:$0xff]  ;;  %v95_v17 = vld [vmem:[%s1207_s1 + $0x240] sm:$0xff]  ;;  %s803_s26 = scalar_lea.vmem %s549_s25, 32 }
  0x28   :  { %677 = vmatprep.mubr.msk.f32.mxu1 %vm829_vm0, %v830_v8  ;;  %790 = vmatprep.subr.bf16.mxu1 %v828_v62  ;;  %v769_v15 = vpack.c.bf16 %v94_v12, %v93_v11  ;;  %v771_v16 = vpack.c.bf16 %v112_v14, %v111_v13  ;;  %v96_v18 = vld [vmem:[%s1207_s1 + $0x248] sm:$0xff]  ;;  %v113_v19 = vld [vmem:[%s1207_s1 + $0x2d0] sm:$0xff]  ;;  %v114_v20 = vld [vmem:[%s1207_s1 + $0x2d8] sm:$0xff]  ;;  %p804_p0 = scmp.ne.s32.totalorder %s549_s25, %s803_s26  ;;  %p809_p2 = scmp.lt.s32.totalorder %s803_s26, %s803_s26 }
  0x29   :  { %762 = vmatpush3.bf16.msra.mxu0 %v761_v1  ;;  %v773_v21 = vpack.c.bf16 %v96_v18, %v95_v17  ;;  %v775_v22 = vpack.c.bf16 %v114_v20, %v113_v19  ;;  %v97_v23 = vld [vmem:[%s1207_s1 + $0x250] sm:$0xff]  ;;  %v98_v24 = vld [vmem:[%s1207_s1 + $0x258] sm:$0xff]  ;;  %v115_v25 = vld [vmem:[%s1207_s1 + $0x2e0] sm:$0xff] }
  0x2a   :  { %764 = vmatprep.subr.bf16.mxu0 %v763_v2  ;;  %678 = vmatmul.mubr.msk.f32.vlgmr.msra.gmra.mrb[2].mxu1 %vm169_vm1, %v161_v5  ;;  %v116_v26 = vld [vmem:[%s1207_s1 + $0x2e8] sm:$0xff]  ;;  %v777_v27 = vpack.c.bf16 %v98_v24, %v97_v23  ;;  %v99_v29 = vld [vmem:[%s1207_s1 + $0x260] sm:$0xff]  ;;  %v117_v31 = vld [vmem:[%s1207_s1 + $0x2f0] sm:$0xff]  ;;  %p810_p3 = por %p809_p2, %p808_p1 }
  0x2b   :  { %688 = vmatprep.mubr.msk.f32.mxu1 %vm829_vm0, %v830_v8  ;;  %v779_v28 = vpack.c.bf16 %v116_v26, %v115_v25  ;;  %v100_v30 = vld [vmem:[%s1207_s1 + $0x268] sm:$0xff]  ;;  %v118_v32 = vld [vmem:[%s1207_s1 + $0x2f8] sm:$0xff]  ;;  %v101_v35 = vld [vmem:[%s1207_s1 + $0x270] sm:$0xff] }
  0x2c   :  { %v781_v33 = vpack.c.bf16 %v100_v30, %v99_v29  ;;  %v783_v34 = vpack.c.bf16 %v118_v32, %v117_v31  ;;  %v102_v36 = vld [vmem:[%s1207_s1 + $0x278] sm:$0xff]  ;;  %v455_v38 = vld [vmem:[%s1209_s3] sm:$0xff]  ;;  %v456_v39 = vld [vmem:[%s1209_s3 + $0x8] sm:$0xff]  ;;  %p811_p4 = pnand %p810_p3, %p804_p0 }
  0x2d   :  { %766 = vmatpush3.bf16.msra.mxu0 %v765_v9  ;;  %v785_v37 = vpack.c.bf16 %v102_v36, %v101_v35  ;;  %v791_v40 = vpack.c.bf16 %v456_v39, %v455_v38  ;;  %v457_v41 = vld [vmem:[%s1209_s3 + $0x10] sm:$0xff]  ;;  %v458_v42 = vld [vmem:[%s1209_s3 + $0x18] sm:$0xff]  ;;  %v556_v45 = vld [vmem:[%s1208_s2] ss:$0 sm:$0xff] }
  0x2e   :  { %768 = vmatprep.subr.bf16.mxu0 %v767_v10  ;;  %v794_v43 = vpack.c.bf16 %v458_v42, %v457_v41 }
  0x2f   :  { %792 = vmatpush3.bf16.msra.mxu1 %v791_v40 }
  0x30   :  { %793 = vmatprep.subr.bf16.mxu1 %v828_v62  ;;  %v558_v62 = vld [vmem:[%s1210_s4] ss:$0 sm:$0xff] }
  0x31   :  { %770 = vmatpush3.bf16.msra.mxu0 %v769_v15 }
  0x32   :  { %772 = vmatprep.subr.bf16.mxu0 %v771_v16 }
  0x33   :  { %795 = vmatpush3.bf16.msra.mxu1 %v794_v43 }
  0x35   :  { %774 = vmatpush3.bf16.msra.mxu0 %v773_v21 }
  0x36   :  { %776 = vmatprep.subr.bf16.mxu0 %v775_v22 }
  0x39   :  { %778 = vmatpush3.bf16.msra.mxu0 %v777_v27 }
  0x3a   :  { %780 = vmatprep.subr.bf16.mxu0 %v779_v28 }
  0x3d   :  { %782 = vmatpush3.bf16.msra.mxu0 %v781_v33 }
  0x3e   :  { %784 = vmatprep.subr.bf16.mxu0 %v783_v34 }
  0x41   :  { %786 = vmatpush3.bf16.msra.mxu0 %v785_v37 }
  0x44   :  { %377 = vmatmul.mubr.f32.vlgmr.msra.gmra.mrb[2].mxu0 %v1092_v58 }
  0xf7   :  { %v592_v44 = vpop.f32.mrb[0].mxu0 }
  0xf8   :  { %v593_v46 = vpop.f32.mrb[1].mxu0 }
  0xf9   :  { %v627_v47 = vpop.f32.mrb[0].mxu1  ;;  %v594_v48 = vadd.f32 %v593_v46, %v592_v44 }
  0xfa   :  { %v628_v49 = vpop.f32.mrb[1].mxu1 }
  0xfb   :  { %v629_v50 = vadd.f32 %v628_v49, %v627_v47  ;;  %v239_v51 = vadd.f32 %v594_v48, %v556_v45 }
  0xfd   :  { %v309_v52 = vadd.f32 %v629_v50, %v239_v51  ;;  %v448_v53 = vpop.f32.mrb[2].mxu1 }
  0xfe   :  { %v679_v54 = vpop.f32.mrb[3].mxu1 }
 0x117   :  { %v662_v55 = vpop.f32.mrb[2].mxu0 }
 0x118   :  { %v663_v56 = vpop.f32.mrb[3].mxu0 }
 0x119   :  { %v664_v57 = vadd.f32 %v663_v56, %v662_v55 }
 0x11b   :  { %v379_v58 = vadd.f32 %v664_v57, %v309_v52 }
 0x11d   :  { %v449_v59 = vadd.f32 %v448_v53, %v379_v58 }
 0x11f   :  { %vm452_vm2 = vcmp.gt.f32.partialorder %v449_v59, 0.0  ;;  %v453_v60 = vmul.f32 0.01, %v449_v59 }
 0x121   :  { %v454_v61 = vsel %vm452_vm2, %v449_v59, %v453_v60 }
 0x122   :  { %689 = vmatmul.mubr.msk.f32.vlgmr.msra.gmra.mrb[4].mxu1 %vm466_vm3, %v454_v61 }
 0x1f5   :  { %v536_v63 = vpop.f32.mrb[4].mxu1 }
 0x1f6   :  { %v537_v0 = vadd.f32 %v558_v62, %v536_v63  ;;  %v690_v1 = vpop.f32.mrb[5].mxu1 }
 0x1f8   :  { %541 = vst.msk [vmem:[#allocation2] sm:$0x3] %vm540_vm4, %v537_v0 }
 0x1f9   :  { %814 = shalt.err (!%p811_p4)
}
 0x1fa   :  { %s815_s29 = scalar_lea.hbm %s1211_s5, 32 }
 0x1fb   :  { %p816_p5 = scmp.ne.s32.totalorder %s1211_s5, %s815_s29  ;;  %p819_p6 = scmp.lt.u32.totalorder %s815_s29, %s1211_s5 }
 0x1fd   :  { %p821_p7 = pnand %p819_p6, %p816_p5 }
 0x1ff   :  { %824 = shalt.err (!%p821_p7)
}
 0x200   :  { %551 = dma.vmem_to_hbm [thread:$0]  %s549_s25, 32, %s1211_s5, [#allocation3]  }
 0x201   :  { %825 = dma.done.wait [#allocation3], 32  }
 0x202   :  { %826 = vsyncadd [#allocation3], 4294967264 }
 0x203   :  { %555 = vsyncpa [#allocation3], 1 }

</bundles_post_ra>
